<compile_context>
chip_gen: v5e
topology: v5e:2x2
jax: 0.10.0
libtpu: 0.0.40
codegen_flags: <defaults>
</compile_context>

<pallas_src>
import numpy as np
import jax
import jax.numpy as jnp
from jax.experimental import pallas as pl
from jax.experimental.pallas import tpu as pltpu

# ---- synthetic "dataset" config (the pickle's label cardinalities are not
#      shipped; pick small deterministic cardinalities for the 4 categorical
#      columns) ----
NUM_EMBEDDINGS = (5, 7, 4, 6)   # len(dataset_full.labels[i]) for i in range(4)
EMB_DIM = 3
NUM_NUMERIC = 2                 # X[:, 4:] has 2 numeric features
HIDDEN = 40
EMB_ROWS = sum(NUM_EMBEDDINGS)                 # 22 one-hot rows total
IN_ROWS = EMB_ROWS + NUM_NUMERIC + 1           # 25 packed input rows
OFFSETS = tuple(int(sum(NUM_EMBEDDINGS[:i])) for i in range(4))   # (0, 5, 12, 16)

# static row -> (owning table, offset) maps used to expand ids host-side
_GATHER_MAP = np.concatenate(
    [np.full(n, i, np.int32) for i, n in enumerate(NUM_EMBEDDINGS)])          # (22,)
_ROW_OFFSET = np.concatenate(
    [np.full(n, off, np.int32) for n, off in zip(NUM_EMBEDDINGS, OFFSETS)])   # (22,)

_HP = jax.lax.Precision.HIGHEST


def model_kernel(in_ref, w1_ref, w2_ref, bw_ref, o_ref):
    # Packed per-sample block: (25, TB) int32, batch on the 128 lanes.
    p = in_ref[...]
    row = jax.lax.broadcasted_iota(jnp.int32, p.shape, 0)

    # Layer-1 RHS (25, TB): one compare + one select.
    #  rows < 22 : one-hot (row index == target id, offsets pre-folded)
    #  rows >=22 : the raw float payload (2 numerics + the constant 1.0 row)
    onehot = (row == p).astype(jnp.float32)
    rhs = jnp.where(row < EMB_ROWS, onehot, pltpu.bitcast(p, jnp.float32))

    # Layer 1: ONE MXU matmul (embeddings, numeric weights and b1 all folded).
    h1 = jax.nn.sigmoid(
        jnp.dot(w1_ref[...], rhs,                       # (40, 25) @ (25, TB)
                preferred_element_type=jnp.float32, precision=_HP))

    b2 = bw_ref[0:HIDDEN, :]                            # (40, 1)
    w3 = bw_ref[HIDDEN:2 * HIDDEN, :]                   # (40, 1)
    b3 = bw_ref[2 * HIDDEN:2 * HIDDEN + 1, :]           # (1, 1)

    # Layer 2
    h2 = jax.nn.sigmoid(
        jnp.dot(w2_ref[...], h1,                        # (40, 40) @ (40, TB)
                preferred_element_type=jnp.float32, precision=_HP) + b2)

    # Layer 3: lane-dense output row — VPU mul + sublane reduce, no N=1 matmul.
    o_ref[...] = jnp.sum(h2 * w3, axis=0, keepdims=True) + b3     # (1, TB)


def fold_params(p):
    """Precompute kernel-layout weights (feature-major, embeddings/b1 folded into W1)."""
    w1 = p["w1"]                                         # (14, 40)
    blocks = []
    for i in range(4):
        lo = NUM_NUMERIC + i * EMB_DIM
        blocks.append(jnp.dot(p[f"e{i}"], w1[lo:lo + EMB_DIM, :], precision=_HP))  # (n_i, 40)
    # columns: [folded emb rows (22) | numeric cols (2) | b1 (1)]  ->  (40, 25)
    w1f = jnp.concatenate(blocks + [w1[:NUM_NUMERIC, :], p["b1"]], axis=0).T
    # one sublane-aligned resident block: rows 0..39 = b2, 40..79 = w3, 80 = b3
    bw = jnp.concatenate([p["b2"].T, p["w3"], p["b3"].reshape(1, 1)], axis=0)   # (81, 1)
    return {"w1f": w1f, "w2t": p["w2"].T, "bw": bw}


def _pick_tile(B):
    bp = ((B + 127) // 128) * 128
    if bp <= 256:
        return bp                                   # one tiny tile
    # Large tiles to amortise per-step overhead, but keep >= 2 grid steps so the
    # "parallel" batch axis splits across both TensorCores on v7x.
    half = ((bp // 2 + 127) // 128) * 128
    return max(128, min(4096, half))


def model_forward(x, x_classes, folded, *, tile_b=None):
    B = x.shape[0]
    tile_b = _pick_tile(B) if tile_b is None else tile_b
    assert tile_b % 128 == 0
    num_tiles = pl.cdiv(B, tile_b)
    Bp = num_tiles * tile_b

    # ---- host-side packing into ONE int32 (25, Bp) array ----
    ids = x_classes.astype(jnp.int32).T                                   # (4, B)
    targets = ids[_GATHER_MAP] + jnp.asarray(_ROW_OFFSET)[:, None]        # (22, B)
    xbits = jax.lax.bitcast_convert_type(x.astype(jnp.float32).T, jnp.int32)  # (2, B)
    one_bits = jax.lax.bitcast_convert_type(jnp.float32(1.0), jnp.int32)

    # NOTE: out-of-range categorical ids silently yield a zero embedding row
    # (torch.nn.Embedding would raise). Padding lanes (>= B) are computed with
    # id 0 / value 0 and sliced off below.
    packed = jnp.zeros((IN_ROWS, Bp), jnp.int32)
    packed = packed.at[:EMB_ROWS, :B].set(targets)
    packed = packed.at[EMB_ROWS:EMB_ROWS + NUM_NUMERIC, :B].set(xbits)
    packed = packed.at[IN_ROWS - 1, :].set(one_bits)

    def wspec(shape):
        return pl.BlockSpec(shape, lambda i: (0, 0))     # weights stay resident in VMEM

    out = pl.pallas_call(
        model_kernel,
        out_shape=jax.ShapeDtypeStruct((1, Bp), jnp.float32),
        grid=(num_tiles,),
        in_specs=[
            pl.BlockSpec((IN_ROWS, tile_b), lambda i: (0, i)),
            wspec((HIDDEN, IN_ROWS)),
            wspec((HIDDEN, HIDDEN)),
            wspec((2 * HIDDEN + 1, 1)),
        ],
        out_specs=pl.BlockSpec((1, tile_b), lambda i: (0, i)),
        compiler_params=pltpu.CompilerParams(dimension_semantics=("parallel",)),
        # tile_b <= 4096 keeps all live intermediates well under the default
        # scoped VMEM on every generation (incl. v7x's 64 MiB), so no
        # vmem_limit_bytes override is needed.
    )(packed, folded["w1f"], folded["w2t"], folded["bw"])

    return out[0, :B].reshape(B, 1)


def init_params(key):
    ks = jax.random.split(key, 8)
    params = {}
    # Embeddings: torch.nn.Embedding default init ~ N(0, 1)
    for i, n in enumerate(NUM_EMBEDDINGS):
        params[f"e{i}"] = jax.random.normal(ks[i], (n, EMB_DIM), jnp.float32)
    d_in = NUM_NUMERIC + 4 * EMB_DIM   # 14

    def lin(k, fin, fout):
        kw, kb = jax.random.split(k)
        bound = 1.0 / jnp.sqrt(fin)
        w = jax.random.uniform(kw, (fin, fout), jnp.float32, -bound, bound)
        b = jax.random.uniform(kb, (1, fout), jnp.float32, -bound, bound)
        return w, b

    params["w1"], params["b1"] = lin(ks[4], d_in, HIDDEN)
    params["w2"], params["b2"] = lin(ks[5], HIDDEN, HIDDEN)
    params["w3"], params["b3"] = lin(ks[6], HIDDEN, 1)
    return params


def reference_forward(x, x_classes, p):
    embs = [p[f"e{i}"][x_classes[:, i]] for i in range(4)]
    x_cat = jnp.concatenate([x] + embs, axis=-1)
    h1 = jax.nn.sigmoid(jnp.dot(x_cat, p["w1"], precision=_HP) + p["b1"])
    h2 = jax.nn.sigmoid(jnp.dot(h1, p["w2"], precision=_HP) + p["b2"])
    return jnp.dot(h2, p["w3"], precision=_HP) + p["b3"]


if __name__ == "__main__":
    key = jax.random.PRNGKey(0)
    kp, kx, kc = jax.random.split(key, 3)
    params = init_params(kp)
    folded = fold_params(params)

    # small test (single batch tile)
    B = 8
    x = jax.random.normal(kx, (B, NUM_NUMERIC), jnp.float32) * 0.5
    x_classes = jnp.stack(
        [jax.random.randint(jax.random.fold_in(kc, i), (B,), 0, n)
         for i, n in enumerate(NUM_EMBEDDINGS)],
        axis=-1).astype(jnp.int32)                          # (B, 4)

    y = jax.block_until_ready(model_forward(x, x_classes, folded))
    y_ref = reference_forward(x, x_classes, params)
    assert y.shape == (B, 1)
    assert jnp.allclose(y, y_ref, atol=1e-4, rtol=1e-4), "mismatch vs reference (B=8)"

    # multi-tile + ragged-padding path (3 grid steps)
    B2 = 300
    kx2, kc2 = jax.random.split(jax.random.fold_in(key, 7))
    x2 = jax.random.normal(kx2, (B2, NUM_NUMERIC), jnp.float32) * 0.5
    xc2 = jnp.stack(
        [jax.random.randint(jax.random.fold_in(kc2, i), (B2,), 0, n)
         for i, n in enumerate(NUM_EMBEDDINGS)],
        axis=-1).astype(jnp.int32)
    y2 = jax.block_until_ready(model_forward(x2, xc2, folded, tile_b=128))
    y2_ref = reference_forward(x2, xc2, params)
    assert y2.shape == (B2, 1)
    assert jnp.allclose(y2, y2_ref, atol=1e-4, rtol=1e-4), "mismatch vs reference (B=300)"

    print("KERNEL_OK")
</pallas_src>

<mosaic_0001>
module attributes {stable_mosaic.version = 11 : i64} {
  func.func @model_kernel(%arg0: i32, %arg1: memref<25x128xi32, #tpu.memory_space<vmem>>, %arg2: memref<40x25xf32, #tpu.memory_space<vmem>>, %arg3: memref<40x40xf32, #tpu.memory_space<vmem>>, %arg4: memref<81x1xf32, #tpu.memory_space<vmem>>, %arg5: memref<1x128xf32, #tpu.memory_space<vmem>>) attributes {dimension_semantics = [#tpu.dimension_semantics<parallel>], iteration_bounds = array<i64: 1>, scalar_prefetch = 0 : i64, scratch_operands = 0 : i64, tpu.core_type = #tpu.core_type<tc>, window_params = [{transform_indices = @transform_0, window_bounds = array<i64: 25, 128>}, {pipeline_mode = #tpu.pipeline_mode<synchronous>, transform_indices = @transform_1, window_bounds = array<i64: 40, 25>}, {pipeline_mode = #tpu.pipeline_mode<synchronous>, transform_indices = @transform_2, window_bounds = array<i64: 40, 40>}, {pipeline_mode = #tpu.pipeline_mode<synchronous>, transform_indices = @transform_3, window_bounds = array<i64: 81, 1>}, {transform_indices = @transform_4, window_bounds = array<i64: 1, 128>}]} {
    %c0 = arith.constant 0 : index
    %c0_0 = arith.constant 0 : index
    %0 = vector.load %arg1[%c0, %c0_0] : memref<25x128xi32, #tpu.memory_space<vmem>>, vector<25x128xi32>
    %1 = tpu.iota {dimensions = array<i32: 0>} : vector<25x128xi32>
    %2 = arith.cmpi eq, %1, %0 : vector<25x128xi32>
    %3 = arith.extui %2 : vector<25x128xi1> to vector<25x128xi32>
    %4 = arith.sitofp %3 : vector<25x128xi32> to vector<25x128xf32>
    %c22_i32 = arith.constant 22 : i32
    %5 = vector.broadcast %c22_i32 : i32 to vector<25x128xi32>
    %6 = arith.cmpi slt, %1, %5 : vector<25x128xi32>
    %7 = tpu.bitcast %0 : vector<25x128xi32> -> vector<25x128xf32>
    %8 = arith.select %6, %4, %7 : vector<25x128xi1>, vector<25x128xf32>
    %c0_1 = arith.constant 0 : index
    %c0_2 = arith.constant 0 : index
    %9 = vector.load %arg2[%c0_1, %c0_2] : memref<40x25xf32, #tpu.memory_space<vmem>>, vector<40x25xf32>
    %cst = arith.constant dense<0.000000e+00> : vector<40x128xf32>
    %10 = tpu.matmul %9, %8, %cst {dimension_numbers = #tpu.dot_dimension_numbers<[1], [0], [0], [1], [0, 0, 1, 1], [], []>, precision = #tpu.contract_precision<fp32>} : vector<40x25xf32>, vector<25x128xf32>, vector<40x128xf32> -> vector<40x128xf32>
    %11 = arith.negf %10 : vector<40x128xf32>
    %12 = math.exp %11 : vector<40x128xf32>
    %cst_3 = arith.constant 1.000000e+00 : f32
    %13 = vector.broadcast %cst_3 : f32 to vector<40x128xf32>
    %14 = arith.addf %13, %12 : vector<40x128xf32>
    %15 = arith.divf %13, %14 : vector<40x128xf32>
    %c0_4 = arith.constant 0 : index
    %c0_5 = arith.constant 0 : index
    %16 = vector.load %arg4[%c0_4, %c0_5] : memref<81x1xf32, #tpu.memory_space<vmem>>, vector<40x1xf32>
    %c40 = arith.constant 40 : index
    %c0_6 = arith.constant 0 : index
    %17 = vector.load %arg4[%c40, %c0_6] : memref<81x1xf32, #tpu.memory_space<vmem>>, vector<40x1xf32>
    %c80 = arith.constant 80 : index
    %c0_7 = arith.constant 0 : index
    %18 = vector.load %arg4[%c80, %c0_7] : memref<81x1xf32, #tpu.memory_space<vmem>>, vector<1x1xf32>
    %c0_8 = arith.constant 0 : index
    %c0_9 = arith.constant 0 : index
    %19 = vector.load %arg3[%c0_8, %c0_9] : memref<40x40xf32, #tpu.memory_space<vmem>>, vector<40x40xf32>
    %cst_10 = arith.constant dense<0.000000e+00> : vector<40x128xf32>
    %20 = tpu.matmul %19, %15, %cst_10 {dimension_numbers = #tpu.dot_dimension_numbers<[1], [0], [0], [1], [0, 0, 1, 1], [], []>, precision = #tpu.contract_precision<fp32>} : vector<40x40xf32>, vector<40x128xf32>, vector<40x128xf32> -> vector<40x128xf32>
    %21 = vector.broadcast %16 : vector<40x1xf32> to vector<40x128xf32>
    %22 = arith.addf %20, %21 : vector<40x128xf32>
    %23 = arith.negf %22 : vector<40x128xf32>
    %24 = math.exp %23 : vector<40x128xf32>
    %cst_11 = arith.constant 1.000000e+00 : f32
    %25 = vector.broadcast %cst_11 : f32 to vector<40x128xf32>
    %26 = arith.addf %25, %24 : vector<40x128xf32>
    %27 = arith.divf %25, %26 : vector<40x128xf32>
    %28 = vector.broadcast %17 : vector<40x1xf32> to vector<40x128xf32>
    %29 = arith.mulf %27, %28 : vector<40x128xf32>
    %cst_12 = arith.constant dense<0.000000e+00> : vector<128xf32>
    %30 = vector.multi_reduction <add>, %29, %cst_12 [0] : vector<40x128xf32> to vector<128xf32>
    %31 = vector.shape_cast %30 : vector<128xf32> to vector<1x128xf32>
    %32 = vector.broadcast %18 : vector<1x1xf32> to vector<1x128xf32>
    %33 = arith.addf %31, %32 : vector<1x128xf32>
    %c0_13 = arith.constant 0 : index
    %c0_14 = arith.constant 0 : index
    %34 = vector.load %arg5[%c0_13, %c0_14] : memref<1x128xf32, #tpu.memory_space<vmem>>, vector<1x128xf32>
    tpu.vector_store %arg5[%c0_13, %c0_14], %33 {strides = array<i32>} : memref<1x128xf32, #tpu.memory_space<vmem>>, vector<1x128xf32>,
    return
  }
  func.func @transform_0(%arg0: i32) -> (i32, i32) {
    %c0_i32 = arith.constant 0 : i32
    %c0_i32_0 = arith.constant 0 : i32
    return %c0_i32, %arg0 : i32, i32
  }
  func.func @transform_1(%arg0: i32) -> (i32, i32) {
    %c0_i32 = arith.constant 0 : i32
    %c0_i32_0 = arith.constant 0 : i32
    %c0_i32_1 = arith.constant 0 : i32
    return %c0_i32, %c0_i32_0 : i32, i32
  }
  func.func @transform_2(%arg0: i32) -> (i32, i32) {
    %c0_i32 = arith.constant 0 : i32
    %c0_i32_0 = arith.constant 0 : i32
    %c0_i32_1 = arith.constant 0 : i32
    return %c0_i32, %c0_i32_0 : i32, i32
  }
  func.func @transform_3(%arg0: i32) -> (i32, i32) {
    %c0_i32 = arith.constant 0 : i32
    %c0_i32_0 = arith.constant 0 : i32
    %c0_i32_1 = arith.constant 0 : i32
    return %c0_i32, %c0_i32_0 : i32, i32
  }
  func.func @transform_4(%arg0: i32) -> (i32, i32) {
    %c0_i32 = arith.constant 0 : i32
    %c0_i32_0 = arith.constant 0 : i32
    return %c0_i32, %arg0 : i32, i32
  }
}

</mosaic_0001>

<bundles_post_ra>
// kernel: tpu_custom_call.1
= control target key start
LH: loop header
LB: loop body
LE: loop exit
PB: predicated region body
PF: predicated region fallthrough
CT: control target
= control target key end

     0   :  { %vm72_vm0 = vcmask 1040384   ;;  %v22_v1 = vlaneseq  ;;  %vm56_vm1 = vcmask 203776   ;;  %s1482_s0 = inlined_call_operand.vmem [shape: s32[25,128], index: 0, kind: input, shape index: {}]   ;;  %s1483_s1 = inlined_call_operand.vmem [shape: f32[40,25], index: 1, kind: input, shape index: {}]   ;;  %s1484_s2 = inlined_call_operand.vmem [shape: f32[40,40], index: 2, kind: input, shape index: {}]   ;;  %s1485_s3 = inlined_call_operand.vmem [shape: f32[81,1], index: 3, kind: input, shape index: {}]   ;;  %s1486_s4 = inlined_call_operand.hbm [shape: f32[1,128], index: 4, kind: output, shape index: {}]  }
   0x1   :  { %v21_v0 = vld [vmem:[%s1482_s0 + $0x18] sm:$0x1]  ;;  %v1145_v3 = vld [vmem:[%s1482_s0] sm:$0xff]  ;;  %v52_v5 = vld [vmem:[%s1483_s1 + $0x8] sm:$0xff] }
   0x2   :  { %v74_v2 = vsel %vm72_vm0, %v21_v0, 0  ;;  %v51_v4 = vld [vmem:[%s1483_s1] sm:$0xff]  ;;  %v20_v7 = vld [vmem:[%s1482_s0 + $0x10] sm:$0xff]  ;;  %v1158_v8 = vshrl.u32 %v22_v1, 7  ;;  %v61_v10 = vsel %vm56_vm1, %v52_v5, 0  ;;  %v1165_v11 = vld [vmem:[%s1482_s0 + $0x8] sm:$0xff] }
   0x3   :  { %v1153_v6 = vand.u32 4294901760, %v74_v2  ;;  %v58_v9 = vsel %vm56_vm1, %v51_v4, 0  ;;  %v1169_v13 = vand.u32 4294901760, %v61_v10 }
   0x4   :  { %v1167_v12 = vand.u32 4294901760, %v58_v9 }
   0x5   :  { %9 = vsyncpa [#allocation3], 0  ;;  %89 = vmatpush.msra.mxu0 %v1153_v6  ;;  %v25_v14 = vadd.s32 16, %v1158_v8  ;;  %v1174_v15 = vadd.s32 8, %v1158_v8  ;;  %v150_v16 = vsub.f32 %v74_v2, %v1153_v6  ;;  %vm27_vm2 = vcmp.eq.s32.totalorder %v1158_v8, %v1145_v3  ;;  %257 = vmatpush.msra.mxu3 %v1153_v6  ;;  %v53_v21 = vld [vmem:[%s1483_s1 + $0x10] sm:$0xff]  ;;  %v54_v43 = vld [vmem:[%s1483_s1 + $0x18] sm:$0xff] }
   0x6   :  { %v97_v17 = vsub.f32 %v58_v9, %v1167_v12  ;;  %v1110_v18 = vmov 0.0   ;;  %v105_v29 = vsub.f32 %v61_v10, %v1169_v13  ;;  %v64_v32 = vsel %vm56_vm1, %v53_v21, 0  ;;  %v55_v55 = vld [vmem:[%s1483_s1 + $0x20] sm:$0xff]  ;;  %s1008_s11 = sshll.u32 %s1486_s4, 4  ;;  %s1009_s11 = int_to_ptr.hbm [resolvable:$true] %s1008_s11 }
   0x7   :  { %v1017_v19 = vsel %vm27_vm2, 1.0, %v1110_v18  ;;  %vm29_vm3 = vcmp.eq.s32.totalorder %v25_v14, %v20_v7  ;;  %vm41_vm4 = vcmp.lt.s32.totalorder %v25_v14, 22  ;;  %vm28_vm5 = vcmp.eq.s32.totalorder %v1174_v15, %v1165_v11  ;;  %208 = vmatpush.msra.mxu2 %v150_v16 }
   0x8   :  { %v151_v20 = vand.u32 4294901760, %v150_v16  ;;  %v1019_v22 = vsel %vm29_vm3, 1.0, %v1110_v18  ;;  %v98_v23 = vand.u32 4294901760, %v97_v17  ;;  %v1018_v24 = vsel %vm28_vm5, 1.0, %v1110_v18 }
   0x9   :  { %v168_v25 = vsub.f32 %v1017_v19, %v1017_v19  ;;  %v49_v26 = vsel %vm41_vm4, %v1019_v22, %v20_v7  ;;  %v162_v28 = vsub.f32 %v1018_v24, %v1018_v24  ;;  %v106_v38 = vand.u32 4294901760, %v105_v29 }
   0xa   :  { %v152_v27 = vsub.f32 %v150_v16, %v151_v20  ;;  %v90_v30 = vand.u32 4294901760, %v49_v26  ;;  %v99_v31 = vsub.f32 %v97_v17, %v98_v23  ;;  %v1194_v39 = vand.u32 4294901760, %v64_v32 }
   0xb   :  { %v163_v34 = vand.u32 4294901760, %v162_v28  ;;  %v169_v36 = vand.u32 4294901760, %v168_v25  ;;  %v1111_v40 = vmov 1.0   ;;  %v107_v46 = vsub.f32 %v105_v29, %v106_v38 }
   0xc   :  { %v153_v33 = vand.u32 4294901760, %v152_v27  ;;  %91 = vmatpush.msra.mxu0 %v90_v30  ;;  %v156_v35 = vsub.f32 %v49_v26, %v90_v30  ;;  %259 = vmatpush.msra.mxu3 %v90_v30  ;;  %v100_v37 = vand.u32 4294901760, %v99_v31  ;;  %v113_v47 = vsub.f32 %v64_v32, %v1194_v39 }
   0xd   :  { %v164_v42 = vsub.f32 %v162_v28, %v163_v34  ;;  %v170_v45 = vsub.f32 %v168_v25, %v169_v36  ;;  %v67_v50 = vsel %vm56_vm1, %v54_v43, 0  ;;  %v108_v52 = vand.u32 4294901760, %v107_v46 }
   0xe   :  { %154 = vmatpush.msra.mxu1 %v153_v33  ;;  %1021 = vmatpush.msk.msra.mxu0 %vm28_vm5, %v1111_v40  ;;  %v157_v41 = vand.u32 4294901760, %v156_v35  ;;  %v114_v53 = vand.u32 4294901760, %v113_v47  ;;  %v120_v54 = vand.u32 4294901760, %v67_v50  ;;  %v70_v58 = vsel %vm56_vm1, %v55_v55, 0 }
   0xf   :  { %211 = vmatpush.msra.mxu2 %v156_v35  ;;  %1023 = vmatpush.msk.msra.mxu3 %vm28_vm5, %v1111_v40  ;;  %v165_v49 = vand.u32 4294901760, %v164_v42  ;;  %v171_v51 = vand.u32 4294901760, %v170_v45  ;;  %v128_v61 = vand.u32 4294901760, %v70_v58  ;;  %vm521_vm11 = vcmask 326656  }
  0x10   :  { %1022 = vmatpush.msk.msra.mxu0 %vm27_vm2, %v1111_v40  ;;  %v158_v44 = vsub.f32 %v156_v35, %v157_v41  ;;  %v115_v56 = vsub.f32 %v113_v47, %v114_v53  ;;  %v121_v57 = vsub.f32 %v67_v50, %v120_v54 }
  0x11   :  { %214 = vmatpush.msra.mxu2 %v162_v28  ;;  %101 = vmatmul.f32.vlgmr.msra.gmra.mxu0 %v100_v37  ;;  %v129_v63 = vsub.f32 %v70_v58, %v128_v61 }
  0x12   :  { %1024 = vmatpush.msk.msra.mxu3 %vm27_vm2, %v1111_v40  ;;  %v159_v48 = vand.u32 4294901760, %v158_v44  ;;  %310 = vmatpush.msrb.mxu0 %v151_v20  ;;  %v116_v59 = vand.u32 4294901760, %v115_v56  ;;  %v122_v60 = vand.u32 4294901760, %v121_v57 }
  0x13   :  { %217 = vmatpush.msra.mxu2 %v168_v25  ;;  %267 = vmatmul.f32.vlgmr.msra.gmra.mxu3 %v98_v23  ;;  %v130_v1 = vand.u32 4294901760, %v129_v63 }
  0x14   :  { %220 = vmatmul.f32.vlgmr.msra.gmra.mxu2 %v97_v17  ;;  %160 = vmatpush.msra.mxu1 %v159_v48  ;;  %v123_v62 = vsub.f32 %v121_v57, %v122_v60 }
  0x15   :  { %314 = vmatpush.msrb.mxu0 %v157_v41  ;;  %v131_v2 = vsub.f32 %v129_v63, %v130_v1 }
  0x16   :  { %166 = vmatpush.msra.mxu1 %v165_v49  ;;  %v124_v0 = vand.u32 4294901760, %v123_v62 }
  0x17   :  { %318 = vmatpush.msrb.mxu0 %v163_v34  ;;  %v132_v4 = vand.u32 4294901760, %v131_v2 }
  0x18   :  { %172 = vmatpush.msra.mxu1 %v171_v51 }
  0x19   :  { %109 = vmatmul.f32.gmra.mxu0 %v108_v52  ;;  %174 = vmatmul.f32.vlgmr.msra.gmra.mxu1 %v1167_v12 }
  0x1a   :  { %322 = vmatpush.msrb.mxu0 %v169_v36  ;;  %357 = vmatpush.msrb.mxu1 %v1153_v6 }
  0x1b   :  { %273 = vmatmul.f32.gmra.mxu3 %v106_v38 }
  0x1c   :  { %225 = vmatmul.f32.gmra.mxu2 %v105_v29  ;;  %359 = vmatpush.msrb.mxu1 %v90_v30 }
  0x1e   :  { %1025 = vmatpush.msk.msrb.mxu1 %vm28_vm5, %v1111_v40 }
  0x20   :  { %1026 = vmatpush.msk.msrb.mxu1 %vm27_vm2, %v1111_v40 }
  0x21   :  { %117 = vmatmul.f32.gmra.mxu0 %v116_v59  ;;  %178 = vmatmul.f32.gmra.mxu1 %v1169_v13 }
  0x23   :  { %279 = vmatmul.f32.gmra.mxu3 %v114_v53 }
  0x24   :  { %230 = vmatmul.f32.gmra.mxu2 %v113_v47 }
  0x29   :  { %125 = vmatmul.f32.gmra.mxu0 %v124_v0  ;;  %182 = vmatmul.f32.gmra.mxu1 %v1194_v39 }
  0x2b   :  { %285 = vmatmul.f32.gmra.mxu3 %v122_v60 }
  0x2c   :  { %235 = vmatmul.f32.gmra.mxu2 %v121_v57 }
  0x31   :  { %133 = vmatmul.f32.gmra.mxu0 %v132_v4  ;;  %186 = vmatmul.f32.gmra.mxu1 %v120_v54 }
  0x33   :  { %291 = vmatmul.f32.gmra.mxu3 %v130_v1 }
  0x34   :  { %240 = vmatmul.f32.gmra.mxu2 %v129_v63 }
  0x39   :  { %190 = vmatmul.f32.gmra.mxu1 %v128_v61  ;;  %324 = vmatmul.f32.vlgmr.msrb.gmra.mxu0 %v1167_v12 }
  0x41   :  { %328 = vmatmul.f32.gmra.mxu0 %v1169_v13  ;;  %365 = vmatmul.f32.vlgmr.msrb.gmra.mxu1 %v1167_v12 }
  0x49   :  { %332 = vmatmul.f32.gmra.mxu0 %v1194_v39  ;;  %369 = vmatmul.f32.gmra.mxu1 %v1169_v13 }
  0x51   :  { %336 = vmatmul.f32.gmra.mxu0 %v120_v54  ;;  %373 = vmatmul.f32.gmra.mxu1 %v1194_v39 }
  0x59   :  { %340 = vmatmul.f32.gmra.mxu0 %v128_v61  ;;  %377 = vmatmul.f32.gmra.mxu1 %v120_v54 }
  0x61   :  { %381 = vmatmul.f32.gmra.mxu1 %v128_v61 }
  0x8e   :  { %v102_v3 = vpop.f32.mrf.mxu0 }
  0x96   :  { %v110_v5 = vpop.f32.mrf.mxu0  ;;  %v175_v6 = vpop.f32.mrf.mxu1 }
  0x97   :  { %v176_v7 = vadd.f32 %v175_v6, %v102_v3  ;;  %v221_v14 = vpop.f32.mrf.mxu2  ;;  %v268_v16 = vpop.f32.mrf.mxu3 }
  0x99   :  { %v222_v21 = vadd.f32 %v221_v14, %v176_v7 }
  0x9b   :  { %v269_v26 = vadd.f32 %v268_v16, %v222_v21 }
  0x9e   :  { %v118_v8 = vpop.f32.mrf.mxu0  ;;  %v179_v9 = vpop.f32.mrf.mxu1 }
  0x9f   :  { %v226_v17 = vpop.f32.mrf.mxu2  ;;  %v274_v19 = vpop.f32.mrf.mxu3  ;;  %v180_v20 = vadd.f32 %v179_v9, %v110_v5 }
  0xa1   :  { %v227_v24 = vadd.f32 %v226_v17, %v180_v20 }
  0xa3   :  { %v275_v27 = vadd.f32 %v274_v19, %v227_v24 }
  0xa6   :  { %v126_v10 = vpop.f32.mrf.mxu0  ;;  %v183_v11 = vpop.f32.mrf.mxu1 }
  0xa7   :  { %v231_v25 = vpop.f32.mrf.mxu2  ;;  %v184_v28 = vadd.f32 %v183_v11, %v118_v8  ;;  %v280_v30 = vpop.f32.mrf.mxu3 }
  0xa9   :  { %v232_v35 = vadd.f32 %v231_v25, %v184_v28 }
  0xab   :  { %v281_v40 = vadd.f32 %v280_v30, %v232_v35  ;;  %v491_v30 = vld [vmem:[%s1484_s2] sm:$0xff] }
  0xae   :  { %v134_v12 = vpop.f32.mrf.mxu0  ;;  %v187_v15 = vpop.f32.mrf.mxu1 }
  0xaf   :  { %v236_v39 = vpop.f32.mrf.mxu2  ;;  %v188_v41 = vadd.f32 %v187_v15, %v126_v10  ;;  %v286_v43 = vpop.f32.mrf.mxu3 }
  0xb1   :  { %v237_v45 = vadd.f32 %v236_v39, %v188_v41 }
  0xb3   :  { %v287_v51 = vadd.f32 %v286_v43, %v237_v45  ;;  %v523_v43 = vsel %vm521_vm11, %v491_v30, 0 }
  0xb6   :  { %v191_v13 = vpop.f32.mrf.mxu1  ;;  %v325_v18 = vpop.f32.mrf.mxu0 }
  0xb7   :  { %v326_v29 = vadd.f32 %v325_v18, %v269_v26  ;;  %v192_v52 = vadd.f32 %v191_v13, %v134_v12  ;;  %v241_v53 = vpop.f32.mrf.mxu2  ;;  %v292_v60 = vpop.f32.mrf.mxu3 }
  0xb9   :  { %v242_v58 = vadd.f32 %v241_v53, %v192_v52 }
  0xbb   :  { %v293_v1 = vadd.f32 %v292_v60, %v242_v58  ;;  %v1309_v58 = vand.u32 4294901760, %v523_v43 }
  0xbe   :  { %v329_v22 = vpop.f32.mrf.mxu0  ;;  %v366_v23 = vpop.f32.mrf.mxu1 }
  0xbf   :  { %v330_v31 = vadd.f32 %v329_v22, %v275_v27  ;;  %v367_v32 = vadd.f32 %v366_v23, %v326_v29 }
  0xc1   :  { %v1027_v37 = vmul.f32 -1.442695, %v367_v32 }
  0xc6   :  { %v333_v33 = vpop.f32.mrf.mxu0  ;;  %v370_v34 = vpop.f32.mrf.mxu1 }
  0xc7   :  { %v371_v36 = vadd.f32 %v370_v34, %v330_v31  ;;  %v334_v42 = vadd.f32 %v333_v33, %v281_v40 }
  0xc9   :  { %v1028_v38 = vmul.f32 -1.442695, %v371_v36 }
  0xcb   :  { %1044 = vpow2.f32 %v1028_v38 }
  0xcc   :  { %1046 = vpow2.f32 %v1027_v37 }
  0xce   :  { %v374_v44 = vpop.f32.mrf.mxu1  ;;  %v337_v47 = vpop.f32.mrf.mxu0 }
  0xcf   :  { %v375_v46 = vadd.f32 %v374_v44, %v334_v42  ;;  %v338_v55 = vadd.f32 %v337_v47, %v287_v51 }
  0xd1   :  { %v1029_v48 = vmul.f32 -1.442695, %v375_v46  ;;  %v1045_v49 = vpop.eup %1044 }
  0xd2   :  { %v1047_v50 = vpop.eup %1046  ;;  %v1233_v54 = vadd.f32 1.0, %v1045_v49 }
  0xd3   :  { %1048 = vpow2.f32 %v1029_v48  ;;  %v1235_v56 = vadd.f32 1.0, %v1047_v50  ;;  %v482_v50 = vld [vmem:[%s1485_s3 + $0x10] sm:$0xff] }
  0xd4   :  { %1050 = vrcp.f32 %v1233_v54  ;;  %vm425_vm8 = vweird.f32 %v1233_v54  ;;  %v429_v33 = vand.u32 2147483647, %v1233_v54  ;;  %v431_v34 = vand.u32 2147483648, %v1233_v54 }
  0xd5   :  { %1052 = vrcp.f32 %v1235_v56  ;;  %vm410_vm6 = vweird.f32 %v1235_v56  ;;  %v414_v42 = vand.u32 2147483647, %v1235_v56  ;;  %v416_v51 = vand.u32 2147483648, %v1235_v56 }
  0xd6   :  { %v378_v57 = vpop.f32.mrf.mxu1  ;;  %v341_v0 = vpop.f32.mrf.mxu0  ;;  %v432_v49 = vor.u32 1.1754944e-38, %v431_v34  ;;  %vm430_vm5 = vcmp.eq.f32.partialorder %v429_v33, 8.507059e+37 }
  0xd7   :  { %v379_v59 = vadd.f32 %v378_v57, %v338_v55  ;;  %v342_v2 = vadd.f32 %v341_v0, %v293_v1 }
  0xd9   :  { %v1049_v61 = vpop.eup %1048  ;;  %v1030_v62 = vmul.f32 -1.442695, %v379_v59 }
  0xda   :  { %v1239_v63 = vadd.f32 1.0, %v1049_v61  ;;  %v1242_v3 = vpop.eup %1050 }
  0xdb   :  { %1054 = vpow2.f32 %v1030_v62  ;;  %v1244_v6 = vpop.eup %1052  ;;  %v421_v10 = vmul.f32 %v1242_v3, %v1233_v54  ;;  %vm426_vm9 = vweird.f32 %v1242_v3  ;;  %v492_v62 = vld [vmem:[%s1484_s2 + $0x8] sm:$0xff] }
  0xdc   :  { %1056 = vrcp.f32 %v1239_v63  ;;  %v406_v12 = vmul.f32 %v1244_v6, %v1235_v56  ;;  %vm411_vm7 = vweird.f32 %v1244_v6  ;;  %vm440_vm13 = vweird.f32 %v1239_v63  ;;  %vm1272_vm14 = vmor %vm425_vm8, %vm426_vm9 }
  0xdd   :  { %v422_v15 = vsub.f32 1.0, %v421_v10  ;;  %v446_v31 = vand.u32 2147483648, %v1239_v63  ;;  %v444_v37 = vand.u32 2147483647, %v1239_v63  ;;  %vm1300_vm3 = vmor %vm410_vm6, %vm411_vm7  ;;  %v417_v56 = vor.u32 1.1754944e-38, %v416_v51 }
  0xde   :  { %v382_v4 = vpop.f32.mrf.mxu1  ;;  %v407_v13 = vsub.f32 1.0, %v406_v12  ;;  %vm415_vm8 = vcmp.eq.f32.partialorder %v414_v42, 8.507059e+37 }
  0xdf   :  { %v383_v5 = vadd.f32 %v382_v4, %v342_v2  ;;  %v423_v20 = vmul.f32 %v1242_v3, %v422_v15  ;;  %v447_v48 = vor.u32 1.1754944e-38, %v446_v31  ;;  %vm445_vm4 = vcmp.eq.f32.partialorder %v444_v37, 8.507059e+37  ;;  %v494_v37 = vld [vmem:[%s1484_s2 + $0x18] sm:$0xff] }
  0xe0   :  { %v408_v24 = vmul.f32 %v1244_v6, %v407_v13  ;;  %v493_v13 = vld [vmem:[%s1484_s2 + $0x10] sm:$0xff] }
  0xe1   :  { %v1055_v7 = vpop.eup %1054  ;;  %v1031_v8 = vmul.f32 -1.442695, %v383_v5  ;;  %v424_v26 = vadd.f32 %v1242_v3, %v423_v20 }
  0xe2   :  { %v1246_v9 = vpop.eup %1056  ;;  %v403_v11 = vadd.f32 1.0, %v1055_v7  ;;  %v409_v38 = vadd.f32 %v1244_v6, %v408_v24  ;;  %v526_v7 = vsel %vm521_vm11, %v492_v62, 0 }
  0xe3   :  { %v436_v14 = vmul.f32 %v1246_v9, %v1239_v63  ;;  %1058 = vpow2.f32 %v1031_v8  ;;  %vm441_vm10 = vweird.f32 %v1246_v9  ;;  %v428_v41 = vsel %vm1272_vm14, %v1242_v3, %v424_v26 }
  0xe4   :  { %1060 = vrcp.f32 %v403_v11  ;;  %v461_v25 = vand.u32 2147483648, %v403_v11  ;;  %v459_v28 = vand.u32 2147483647, %v403_v11  ;;  %vm455_vm15 = vweird.f32 %v403_v11  ;;  %vm1280_vm0 = vmor %vm440_vm13, %vm441_vm10 }
  0xe5   :  { %v437_v16 = vsub.f32 1.0, %v436_v14  ;;  %v413_v53 = vsel %vm1300_vm3, %v1244_v6, %v409_v38  ;;  %v433_v57 = vsel %vm430_vm5, %v432_v49, %v428_v41  ;;  %v1323_v3 = vsub.f32 %v523_v43, %v1309_v58  ;;  %v495_v49 = vld [vmem:[%s1484_s2 + $0x20] sm:$0xff] }
  0xe6   :  { %v462_v40 = vor.u32 1.1754944e-38, %v461_v25  ;;  %vm460_vm2 = vcmp.eq.f32.partialorder %v459_v28, 8.507059e+37  ;;  %v1320_v2 = vand.u32 4294901760, %v433_v57  ;;  %v418_v4 = vsel %vm415_vm8, %v417_v56, %v413_v53 }
  0xe7   :  { %v438_v22 = vmul.f32 %v1246_v9, %v437_v16  ;;  %v560_v14 = vand.u32 4294901760, %v1323_v3  ;;  %v1333_v12 = vand.u32 4294901760, %v526_v7  ;;  %v529_v28 = vsel %vm521_vm11, %v493_v13, 0 }
  0xe8   :  { %v629_v16 = vsub.f32 %v433_v57, %v1320_v2  ;;  %v1355_v34 = vand.u32 4294901760, %v529_v28  ;;  %v532_v43 = vsel %vm521_vm11, %v494_v37, 0  ;;  %v535_v53 = vsel %vm521_vm11, %v495_v49, 0 }
  0xe9   :  { %v1059_v17 = vpop.eup %1058  ;;  %v439_v29 = vadd.f32 %v1246_v9, %v438_v22  ;;  %v567_v24 = vsub.f32 %v526_v7, %v1333_v12  ;;  %v590_v57 = vand.u32 4294901760, %v535_v53 }
  0xea   :  { %v1061_v18 = vpop.eup %1060  ;;  %v1254_v19 = vadd.f32 1.0, %v1059_v17  ;;  %v575_v41 = vsub.f32 %v529_v28, %v1355_v34 }
  0xeb   :  { %v451_v21 = vmul.f32 %v1061_v18, %v403_v11  ;;  %vm456_vm12 = vweird.f32 %v1061_v18  ;;  %v443_v46 = vsel %vm1280_vm0, %v1246_v9, %v439_v29  ;;  %v1330_v11 = vand.u32 4294901760, %v418_v4 }
  0xec   :  { %1062 = vrcp.f32 %v1254_v19  ;;  %vm457_vm1 = vmor %vm455_vm15, %vm456_vm12  ;;  %v476_v54 = vand.u32 2147483648, %v1254_v19  ;;  %v448_v55 = vsel %vm445_vm4, %v447_v48, %v443_v46  ;;  %v474_v60 = vand.u32 2147483647, %v1254_v19 }
  0xed   :  { %v452_v23 = vsub.f32 1.0, %v451_v21  ;;  %vm470_vm7 = vweird.f32 %v1254_v19  ;;  %v1318_v0 = vand.u32 4294901760, %v448_v55  ;;  %v635_v21 = vsub.f32 %v418_v4, %v1330_v11  ;;  %v489_v4 = vld [vmem:[%s1485_s3 + $0x48] sm:$0xff] }
  0xee   :  { %v477_v1 = vor.u32 1.1754944e-38, %v476_v54  ;;  %vm475_vm10 = vcmp.eq.f32.partialorder %v474_v60, 8.507059e+37  ;;  %v568_v33 = vand.u32 4294901760, %v567_v24  ;;  %v582_v48 = vand.u32 4294901760, %v532_v43 }
  0xef   :  { %v453_v27 = vmul.f32 %v1061_v18, %v452_v23  ;;  %v623_v10 = vsub.f32 %v448_v55, %v1318_v0  ;;  %v561_v23 = vsub.f32 %v1323_v3, %v560_v14  ;;  %v636_v31 = vand.u32 4294901760, %v635_v21 }
  0xf1   :  { %v454_v35 = vadd.f32 %v1061_v18, %v453_v27  ;;  %v624_v22 = vand.u32 4294901760, %v623_v10  ;;  %v630_v27 = vand.u32 4294901760, %v629_v16  ;;  %v562_v32 = vand.u32 4294901760, %v561_v23 }
  0xf2   :  { %v1063_v39 = vpop.eup %1062 }
  0xf3   :  { %v466_v44 = vmul.f32 %v1063_v39, %v1254_v19  ;;  %v458_v45 = vsel %vm457_vm1, %v1061_v18, %v454_v35  ;;  %vm471_vm6 = vweird.f32 %v1063_v39  ;;  %v1112_v18 = vmov 0   ;;  %v480_v19 = vld [vmem:[%s1485_s3] sm:$0xff] }
  0xf4   :  { %v463_v47 = vsel %vm460_vm2, %v462_v40, %v458_v45  ;;  %vm472_vm9 = vmor %vm470_vm7, %vm471_vm6  ;;  %1041 = vset.pattern.permute.xlu0 %v1112_v18  ;;  %1042 = vset.pattern.permute.xlu1 %v1112_v18  ;;  %v625_v30 = vsub.f32 %v623_v10, %v624_v22  ;;  %v631_v36 = vsub.f32 %v629_v16, %v630_v27 }
  0xf5   :  { %v467_v52 = vsub.f32 1.0, %v466_v44  ;;  %v1312_v61 = vand.u32 4294901760, %v463_v47  ;;  %498 = vperm.xlu0 %1041, %v480_v19   ;;  %1043 = vset.pattern.permute.xlu2 %v1112_v18  ;;  %v569_v40 = vsub.f32 %v567_v24, %v568_v33  ;;  %v481_v44 = vld [vmem:[%s1485_s3 + $0x8] sm:$0xff] }
  0xf6   :  { %v626_v38 = vand.u32 4294901760, %v625_v30  ;;  %v632_v42 = vand.u32 4294901760, %v631_v36  ;;  %508 = vperm.xlu1 %1042, %v482_v50  }
  0xf7   :  { %v468_v59 = vmul.f32 %v1063_v39, %v467_v52  ;;  %v617_v6 = vsub.f32 %v463_v47, %v1312_v61  ;;  %v570_v46 = vand.u32 4294901760, %v569_v40  ;;  %v576_v47 = vand.u32 4294901760, %v575_v41 }
  0xf8   :  { %v583_v52 = vsub.f32 %v532_v43, %v582_v48 }
  0xf9   :  { %v469_v63 = vadd.f32 %v1063_v39, %v468_v59  ;;  %v618_v17 = vand.u32 4294901760, %v617_v6  ;;  %v577_v51 = vsub.f32 %v575_v41, %v576_v47  ;;  %v483_v59 = vld [vmem:[%s1485_s3 + $0x18] sm:$0xff] }
  0xfa   :  { %v584_v55 = vand.u32 4294901760, %v583_v52 }
  0xfb   :  { %v473_v5 = vsel %vm472_vm9, %v1063_v39, %v469_v63  ;;  %v619_v26 = vsub.f32 %v617_v6, %v618_v17  ;;  %v637_v39 = vsub.f32 %v635_v21, %v636_v31  ;;  %v578_v54 = vand.u32 4294901760, %v577_v51 }
  0xfc   :  { %v478_v8 = vsel %vm475_vm10, %v477_v1, %v473_v5  ;;  %v585_v60 = vsub.f32 %v583_v52, %v584_v55  ;;  %v486_v1 = vld [vmem:[%s1485_s3 + $0x30] sm:$0xff]  ;;  %v484_v5 = vld [vmem:[%s1485_s3 + $0x20] sm:$0xff] }
  0xfd   :  { %v1327_v9 = vand.u32 4294901760, %v478_v8  ;;  %v620_v35 = vand.u32 4294901760, %v619_v26  ;;  %v638_v45 = vand.u32 4294901760, %v637_v39  ;;  %503 = vperm.xlu0 %1041, %v481_v44   ;;  %518 = vperm.xlu2 %1043, %v484_v5  }
  0xfe   :  { %513 = vperm.xlu1 %1042, %v483_v59   ;;  %v586_v56 = vand.u32 4294901760, %v585_v60 }
  0xff   :  { %549 = vmatpush.msrb.mxu2 %v1327_v9  ;;  %725 = vmatpush.msra.mxu1 %v1327_v9  ;;  %v611_v15 = vsub.f32 %v478_v8, %v1327_v9 }
 0x101   :  { %551 = vmatpush.msrb.mxu2 %v1312_v61  ;;  %674 = vmatpush.msra.mxu0 %v611_v15  ;;  %v612_v20 = vand.u32 4294901760, %v611_v15 }
 0x102   :  { %727 = vmatpush.msra.mxu1 %v1312_v61 }
 0x103   :  { %553 = vmatpush.msrb.mxu2 %v1318_v0  ;;  %677 = vmatpush.msra.mxu0 %v617_v6  ;;  %v613_v25 = vsub.f32 %v611_v15, %v612_v20  ;;  %v485_v6 = vld [vmem:[%s1485_s3 + $0x28] sm:$0xff] }
 0x104   :  { %729 = vmatpush.msra.mxu1 %v1318_v0 }
 0x105   :  { %555 = vmatpush.msrb.mxu2 %v1320_v2  ;;  %680 = vmatpush.msra.mxu0 %v623_v10  ;;  %v614_v29 = vand.u32 4294901760, %v613_v25 }
 0x106   :  { %731 = vmatpush.msra.mxu1 %v1320_v2  ;;  %961 = vperm.xlu0 %1041, %v486_v1  }
 0x107   :  { %557 = vmatpush.msrb.mxu2 %v1330_v11  ;;  %615 = vmatpush.msrb.mxu3 %v614_v29 }
 0x108   :  { %683 = vmatpush.msra.mxu0 %v629_v16  ;;  %733 = vmatpush.msra.mxu1 %v1330_v11 }
 0x109   :  { %779 = vmatpush.msra.mxu2 %v612_v20  ;;  %621 = vmatpush.msrb.mxu3 %v620_v35 }
 0x10a   :  { %686 = vmatpush.msra.mxu0 %v635_v21  ;;  %563 = vmatmul.f32.vlgmr.msrb.gmra.mxu2 %v562_v32 }
 0x10b   :  { %783 = vmatpush.msra.mxu2 %v618_v17  ;;  %627 = vmatpush.msrb.mxu3 %v626_v38 }
 0x10c   :  { %689 = vmatmul.f32.vlgmr.msra.gmra.mxu0 %v1323_v3  ;;  %737 = vmatmul.f32.vlgmr.msra.gmra.mxu1 %v560_v14  ;;  %v490_v3 = vld [vmem:[%s1485_s3 + $0x50] sm:$0x1] }
 0x10d   :  { %787 = vmatpush.msra.mxu2 %v624_v22  ;;  %633 = vmatpush.msrb.mxu3 %v632_v42 }
 0x10e   :  { %976 = vperm.xlu0 %1041, %v489_v4   ;;  %956 = vperm.xlu2 %1043, %v485_v6  }
 0x10f   :  { %791 = vmatpush.msra.mxu2 %v630_v27  ;;  %639 = vmatpush.msrb.mxu3 %v638_v45 }
 0x110   :  { %641 = vmatmul.f32.vlgmr.msrb.gmra.mxu3 %v1309_v58 }
 0x111   :  { %795 = vmatpush.msra.mxu2 %v636_v31  ;;  %829 = vmatpush.msra.mxu3 %v1327_v9 }
 0x112   :  { %571 = vmatmul.f32.gmra.mxu2 %v570_v46 }
 0x113   :  { %831 = vmatpush.msra.mxu3 %v1312_v61  ;;  %v591_v61 = vsub.f32 %v535_v53, %v590_v57 }
 0x114   :  { %694 = vmatmul.f32.gmra.mxu0 %v567_v24  ;;  %743 = vmatmul.f32.gmra.mxu1 %v568_v33 }
 0x115   :  { %833 = vmatpush.msra.mxu3 %v1318_v0  ;;  %v592_v62 = vand.u32 4294901760, %v591_v61 }
 0x117   :  { %835 = vmatpush.msra.mxu3 %v1320_v2  ;;  %v593_v63 = vsub.f32 %v591_v61, %v592_v62  ;;  %v487_v2 = vld [vmem:[%s1485_s3 + $0x38] sm:$0xff] }
 0x118   :  { %645 = vmatmul.f32.gmra.mxu3 %v1333_v12  ;;  %966 = vperm.xlu1 %1042, %v487_v2  }
 0x119   :  { %837 = vmatpush.msra.mxu3 %v1330_v11  ;;  %v594_v0 = vand.u32 4294901760, %v593_v63 }
 0x11a   :  { %579 = vmatmul.f32.gmra.mxu2 %v578_v54 }
 0x11c   :  { %699 = vmatmul.f32.gmra.mxu0 %v575_v41  ;;  %749 = vmatmul.f32.gmra.mxu1 %v576_v47 }
 0x120   :  { %649 = vmatmul.f32.gmra.mxu3 %v1355_v34  ;;  %996 = vperm.xlu1 %1042, %v490_v3  }
 0x122   :  { %587 = vmatmul.f32.gmra.mxu2 %v586_v56 }
 0x124   :  { %704 = vmatmul.f32.gmra.mxu0 %v583_v52  ;;  %755 = vmatmul.f32.gmra.mxu1 %v584_v55 }
 0x128   :  { %653 = vmatmul.f32.gmra.mxu3 %v582_v48 }
 0x12a   :  { %595 = vmatmul.f32.gmra.mxu2 %v594_v0 }
 0x12c   :  { %709 = vmatmul.f32.gmra.mxu0 %v591_v61  ;;  %761 = vmatmul.f32.gmra.mxu1 %v592_v62 }
 0x130   :  { %657 = vmatmul.f32.gmra.mxu3 %v590_v57 }
 0x132   :  { %797 = vmatmul.f32.vlgmr.msra.gmra.mxu2 %v1309_v58 }
 0x138   :  { %839 = vmatmul.f32.vlgmr.msra.gmra.mxu3 %v1309_v58  ;;  %v488_v58 = vld [vmem:[%s1485_s3 + $0x40] sm:$0xff]  ;;  %s1113_s3 = smov [#allocation2]  }
 0x139   :  { %971 = vperm.xlu2 %1043, %v488_v58   ;;  %s1006_s8 = sshll.u32 %s1113_s3, 4  ;;  %s1007_s8 = int_to_ptr.vmem [resolvable:$true] %s1006_s8 }
 0x13a   :  { %801 = vmatmul.f32.gmra.mxu2 %v1333_v12 }
 0x140   :  { %843 = vmatmul.f32.gmra.mxu3 %v1333_v12 }
 0x142   :  { %805 = vmatmul.f32.gmra.mxu2 %v1355_v34 }
 0x148   :  { %847 = vmatmul.f32.gmra.mxu3 %v1355_v34 }
 0x14a   :  { %809 = vmatmul.f32.gmra.mxu2 %v582_v48 }
 0x150   :  { %851 = vmatmul.f32.gmra.mxu3 %v582_v48 }
 0x152   :  { %813 = vmatmul.f32.gmra.mxu2 %v590_v57 }
 0x157   :  { %v519_v53 = vpop.permute.xlu2 %518 }
 0x158   :  { %855 = vmatmul.f32.gmra.mxu3 %v590_v57 }
 0x167   :  { %v499_v15 = vpop.permute.xlu0 %498 }
 0x168   :  { %v509_v28 = vpop.permute.xlu1 %508 }
 0x16f   :  { %v504_v20 = vpop.permute.xlu0 %503 }
 0x170   :  { %v514_v41 = vpop.permute.xlu1 %513 }
 0x189   :  { %v690_v16 = vpop.f32.mrf.mxu0  ;;  %v738_v18 = vpop.f32.mrf.mxu1 }
 0x18d   :  { %v564_v7 = vpop.f32.mrf.mxu2 }
 0x18e   :  { %v565_v19 = vadd.f32 %v564_v7, %v499_v15 }
 0x191   :  { %v695_v23 = vpop.f32.mrf.mxu0  ;;  %v744_v27 = vpop.f32.mrf.mxu1 }
 0x193   :  { %v642_v8 = vpop.f32.mrf.mxu3 }
 0x194   :  { %v643_v22 = vadd.f32 %v642_v8, %v565_v19 }
 0x195   :  { %v572_v9 = vpop.f32.mrf.mxu2 }
 0x196   :  { %v573_v24 = vadd.f32 %v572_v9, %v504_v20  ;;  %v691_v26 = vadd.f32 %v690_v16, %v643_v22 }
 0x198   :  { %v739_v30 = vadd.f32 %v738_v18, %v691_v26 }
 0x199   :  { %v700_v36 = vpop.f32.mrf.mxu0  ;;  %v750_v40 = vpop.f32.mrf.mxu1 }
 0x19b   :  { %v646_v10 = vpop.f32.mrf.mxu3 }
 0x19c   :  { %v647_v29 = vadd.f32 %v646_v10, %v573_v24 }
 0x19d   :  { %v580_v11 = vpop.f32.mrf.mxu2 }
 0x19e   :  { %v696_v32 = vadd.f32 %v695_v23, %v647_v29  ;;  %v581_v33 = vadd.f32 %v580_v11, %v509_v28 }
 0x1a0   :  { %v745_v38 = vadd.f32 %v744_v27, %v696_v32 }
 0x1a1   :  { %v705_v50 = vpop.f32.mrf.mxu0  ;;  %v756_v57 = vpop.f32.mrf.mxu1 }
 0x1a3   :  { %v650_v14 = vpop.f32.mrf.mxu3 }
 0x1a4   :  { %v651_v39 = vadd.f32 %v650_v14, %v581_v33 }
 0x1a5   :  { %v588_v12 = vpop.f32.mrf.mxu2 }
 0x1a6   :  { %v701_v46 = vadd.f32 %v700_v36, %v651_v39  ;;  %v589_v47 = vadd.f32 %v588_v12, %v514_v41 }
 0x1a8   :  { %v751_v51 = vadd.f32 %v750_v40, %v701_v46 }
 0x1a9   :  { %v710_v5 = vpop.f32.mrf.mxu0  ;;  %v762_v9 = vpop.f32.mrf.mxu1 }
 0x1ab   :  { %v654_v17 = vpop.f32.mrf.mxu3 }
 0x1ac   :  { %v655_v52 = vadd.f32 %v654_v17, %v589_v47 }
 0x1ad   :  { %v596_v13 = vpop.f32.mrf.mxu2 }
 0x1ae   :  { %v706_v60 = vadd.f32 %v705_v50, %v655_v52  ;;  %v597_v61 = vadd.f32 %v596_v13, %v519_v53 }
 0x1b0   :  { %v757_v4 = vadd.f32 %v756_v57, %v706_v60 }
 0x1b3   :  { %v658_v21 = vpop.f32.mrf.mxu3 }
 0x1b4   :  { %v659_v3 = vadd.f32 %v658_v21, %v597_v61 }
 0x1b5   :  { %v798_v25 = vpop.f32.mrf.mxu2 }
 0x1b6   :  { %v799_v34 = vadd.f32 %v798_v25, %v739_v30  ;;  %v711_v8 = vadd.f32 %v710_v5, %v659_v3 }
 0x1b8   :  { %v763_v15 = vadd.f32 %v762_v9, %v711_v8  ;;  %v967_v8 = vpop.permute.xlu1 %966 }
 0x1bb   :  { %v840_v31 = vpop.f32.mrf.mxu3 }
 0x1bc   :  { %v841_v37 = vadd.f32 %v840_v31, %v799_v34 }
 0x1bd   :  { %v802_v35 = vpop.f32.mrf.mxu2 }
 0x1be   :  { %v803_v42 = vadd.f32 %v802_v35, %v745_v38  ;;  %v1032_v43 = vmul.f32 -1.442695, %v841_v37 }
 0x1c0   :  { %1064 = vpow2.f32 %v1032_v43 }
 0x1c3   :  { %v844_v44 = vpop.f32.mrf.mxu3 }
 0x1c4   :  { %v845_v45 = vadd.f32 %v844_v44, %v803_v42  ;;  %v957_v44 = vpop.permute.xlu2 %956 }
 0x1c5   :  { %v806_v48 = vpop.f32.mrf.mxu2 }
 0x1c6   :  { %v1033_v49 = vmul.f32 -1.442695, %v845_v45  ;;  %v807_v54 = vadd.f32 %v806_v48, %v751_v51  ;;  %v1065_v56 = vpop.eup %1064 }
 0x1c7   :  { %v1415_v2 = vadd.f32 1.0, %v1065_v56 }
 0x1c8   :  { %1066 = vpow2.f32 %v1033_v49 }
 0x1c9   :  { %vm884_vm11 = vweird.f32 %v1415_v2  ;;  %v890_v35 = vand.u32 2147483648, %v1415_v2  ;;  %v888_v45 = vand.u32 2147483647, %v1415_v2 }
 0x1cb   :  { %v848_v55 = vpop.f32.mrf.mxu3  ;;  %v891_v46 = vor.u32 1.1754944e-38, %v890_v35  ;;  %vm889_vm7 = vcmp.eq.f32.partialorder %v888_v45, 8.507059e+37 }
 0x1cc   :  { %v849_v59 = vadd.f32 %v848_v55, %v807_v54 }
 0x1cd   :  { %v810_v62 = vpop.f32.mrf.mxu2 }
 0x1ce   :  { %v1067_v63 = vpop.eup %1066  ;;  %v1034_v0 = vmul.f32 -1.442695, %v849_v59  ;;  %v811_v6 = vadd.f32 %v810_v62, %v757_v4  ;;  %v962_v62 = vpop.permute.xlu0 %961 }
 0x1cf   :  { %v1413_v1 = vadd.f32 1.0, %v1067_v63 }
 0x1d0   :  { %1068 = vpow2.f32 %v1034_v0 }
 0x1d1   :  { %1070 = vrcp.f32 %v1413_v1  ;;  %v903_v40 = vand.u32 2147483647, %v1413_v1  ;;  %v905_v41 = vand.u32 2147483648, %v1413_v1  ;;  %vm899_vm14 = vweird.f32 %v1413_v1 }
 0x1d2   :  { %1072 = vrcp.f32 %v1415_v2 }
 0x1d3   :  { %v852_v58 = vpop.f32.mrf.mxu3  ;;  %vm904_vm4 = vcmp.eq.f32.partialorder %v903_v40, 8.507059e+37  ;;  %v906_v54 = vor.u32 1.1754944e-38, %v905_v41 }
 0x1d4   :  { %v853_v7 = vadd.f32 %v852_v58, %v811_v6 }
 0x1d5   :  { %v814_v12 = vpop.f32.mrf.mxu2 }
 0x1d6   :  { %v1069_v10 = vpop.eup %1068  ;;  %v1035_v11 = vmul.f32 -1.442695, %v853_v7  ;;  %v815_v13 = vadd.f32 %v814_v12, %v763_v15  ;;  %v972_v15 = vpop.permute.xlu2 %971 }
 0x1d7   :  { %v1419_v14 = vadd.f32 1.0, %v1069_v10  ;;  %v1421_v16 = vpop.eup %1070 }
 0x1d8   :  { %1074 = vpow2.f32 %v1035_v11  ;;  %v1424_v17 = vpop.eup %1072  ;;  %v895_v19 = vmul.f32 %v1421_v16, %v1413_v1  ;;  %vm900_vm13 = vweird.f32 %v1421_v16 }
 0x1d9   :  { %1076 = vrcp.f32 %v1419_v14  ;;  %v880_v21 = vmul.f32 %v1424_v17, %v1415_v2  ;;  %vm885_vm12 = vweird.f32 %v1424_v17  ;;  %vm1446_vm0 = vmor %vm899_vm14, %vm900_vm13  ;;  %vm914_vm1 = vweird.f32 %v1419_v14 }
 0x1da   :  { %v896_v26 = vsub.f32 1.0, %v895_v19  ;;  %v920_v48 = vand.u32 2147483648, %v1419_v14  ;;  %vm1456_vm2 = vmor %vm884_vm11, %vm885_vm12  ;;  %v918_v51 = vand.u32 2147483647, %v1419_v14 }
 0x1db   :  { %v856_v18 = vpop.f32.mrf.mxu3  ;;  %v881_v28 = vsub.f32 1.0, %v880_v21  ;;  %v977_v21 = vpop.permute.xlu0 %976 }
 0x1dc   :  { %v857_v20 = vadd.f32 %v856_v18, %v815_v13  ;;  %v897_v30 = vmul.f32 %v1421_v16, %v896_v26  ;;  %v921_v0 = vor.u32 1.1754944e-38, %v920_v48  ;;  %vm919_vm9 = vcmp.eq.f32.partialorder %v918_v51, 8.507059e+37 }
 0x1dd   :  { %v882_v31 = vmul.f32 %v1424_v17, %v881_v28 }
 0x1de   :  { %v1075_v22 = vpop.eup %1074  ;;  %v1036_v23 = vmul.f32 -1.442695, %v857_v20  ;;  %v898_v37 = vadd.f32 %v1421_v16, %v897_v30 }
 0x1df   :  { %v1077_v24 = vpop.eup %1076  ;;  %v877_v25 = vadd.f32 1.0, %v1075_v22  ;;  %v883_v39 = vadd.f32 %v1424_v17, %v882_v31 }
 0x1e0   :  { %1078 = vpow2.f32 %v1036_v23  ;;  %v910_v27 = vmul.f32 %v1077_v24, %v1419_v14  ;;  %vm915_vm15 = vweird.f32 %v1077_v24  ;;  %v902_v50 = vsel %vm1446_vm0, %v1421_v16, %v898_v37 }
 0x1e1   :  { %1080 = vrcp.f32 %v877_v25  ;;  %v887_v53 = vsel %vm1456_vm2, %v1424_v17, %v883_v39  ;;  %vm1468_vm5 = vmor %vm914_vm1, %vm915_vm15  ;;  %v935_v57 = vand.u32 2147483648, %v877_v25  ;;  %vm929_vm6 = vweird.f32 %v877_v25 }
 0x1e2   :  { %v911_v29 = vsub.f32 1.0, %v910_v27  ;;  %v933_v61 = vand.u32 2147483647, %v877_v25  ;;  %v907_v63 = vsel %vm904_vm4, %v906_v54, %v902_v50  ;;  %v892_v1 = vsel %vm889_vm7, %v891_v46, %v887_v53 }
 0x1e3   :  { %v936_v5 = vor.u32 1.1754944e-38, %v935_v57  ;;  %v980_v6 = vmul.f32 %v962_v62, %v907_v63  ;;  %v979_v7 = vmul.f32 %v957_v44, %v892_v1 }
 0x1e4   :  { %v912_v33 = vmul.f32 %v1077_v24, %v911_v29  ;;  %vm934_vm10 = vcmp.eq.f32.partialorder %v933_v61, 8.507059e+37 }
 0x1e5   :  { %v984_v16 = vadd.f32 %v980_v6, %v979_v7 }
 0x1e6   :  { %v1079_v32 = vpop.eup %1078  ;;  %v913_v42 = vadd.f32 %v1077_v24, %v912_v33 }
 0x1e7   :  { %v1081_v34 = vpop.eup %1080  ;;  %v1435_v36 = vadd.f32 1.0, %v1079_v32  ;;  %v997_v32 = vpop.permute.xlu1 %996 }
 0x1e8   :  { %v925_v38 = vmul.f32 %v1081_v34, %v877_v25  ;;  %vm930_vm3 = vweird.f32 %v1081_v34  ;;  %v917_v59 = vsel %vm1468_vm5, %v1077_v24, %v913_v42 }
 0x1e9   :  { %1082 = vrcp.f32 %v1435_v36  ;;  %vm931_vm8 = vmor %vm929_vm6, %vm930_vm3  ;;  %v922_v3 = vsel %vm919_vm9, %v921_v0, %v917_v59  ;;  %v950_v9 = vand.u32 2147483648, %v1435_v36  ;;  %v948_v12 = vand.u32 2147483647, %v1435_v36 }
 0x1ea   :  { %v926_v43 = vsub.f32 1.0, %v925_v38  ;;  %v981_v11 = vmul.f32 %v967_v8, %v922_v3  ;;  %vm944_vm12 = vweird.f32 %v1435_v36 }
 0x1eb   :  { %v951_v18 = vor.u32 1.1754944e-38, %v950_v9  ;;  %vm949_vm14 = vcmp.eq.f32.partialorder %v948_v12, 8.507059e+37 }
 0x1ec   :  { %v927_v52 = vmul.f32 %v1081_v34, %v926_v43  ;;  %v985_v19 = vadd.f32 %v984_v16, %v981_v11 }
 0x1ee   :  { %v928_v60 = vadd.f32 %v1081_v34, %v927_v52 }
 0x1ef   :  { %v1083_v56 = vpop.eup %1082 }
 0x1f0   :  { %v940_v2 = vmul.f32 %v1083_v56, %v1435_v36  ;;  %v932_v4 = vsel %vm931_vm8, %v1081_v34, %v928_v60  ;;  %vm945_vm11 = vweird.f32 %v1083_v56 }
 0x1f1   :  { %v937_v10 = vsel %vm934_vm10, %v936_v5, %v932_v4  ;;  %vm946_vm13 = vmor %vm944_vm12, %vm945_vm11 }
 0x1f2   :  { %v941_v58 = vsub.f32 1.0, %v940_v2  ;;  %v982_v13 = vmul.f32 %v972_v15, %v937_v10 }
 0x1f4   :  { %v942_v14 = vmul.f32 %v1083_v56, %v941_v58  ;;  %v986_v24 = vadd.f32 %v985_v19, %v982_v13 }
 0x1f6   :  { %v943_v17 = vadd.f32 %v1083_v56, %v942_v14 }
 0x1f8   :  { %v947_v20 = vsel %vm946_vm13, %v1083_v56, %v943_v17 }
 0x1f9   :  { %v952_v22 = vsel %vm949_vm14, %v951_v18, %v947_v20 }
 0x1fa   :  { %v983_v23 = vmul.f32 %v977_v21, %v952_v22 }
 0x1fc   :  { %v987_v25 = vadd.f32 %v986_v24, %v983_v23 }
 0x1fe   :  { %v988_v26 = vrot.slane %v987_v25, 4 }
 0x200   :  { %v989_v27 = vadd.f32 %v988_v26, %v987_v25 }
 0x202   :  { %v990_v28 = vrot.slane %v989_v27, 2 }
 0x204   :  { %v991_v29 = vadd.f32 %v990_v28, %v989_v27 }
 0x206   :  { %v992_v30 = vrot.slane %v991_v29, 1 }
 0x208   :  { %v993_v31 = vadd.f32 %v992_v30, %v991_v29 }
 0x20a   :  { %v999_v33 = vadd.f32 %v997_v32, %v993_v31 }
 0x20c   :  { %1000 = vst [vmem:[#allocation2] sm:$0x1] %v999_v33 }
 0x20d   :  { %1011 = dma.vmem_to_hbm [thread:$0]  %s1007_s8, 16, %s1009_s11, [#allocation3]  }
 0x20e   :  { %1108 = dma.done.wait [#allocation3], 16  }
 0x20f   :  { %1109 = vsyncadd [#allocation3], 4294967280 }
 0x210   :  { %1016 = vsyncpa [#allocation3], 1 }

</bundles_post_ra>
